<compile_context>
chip_gen: v6e
topology: v6e:2x2x1
jax: 0.10.0
libtpu: 0.0.40
codegen_flags: <defaults>
</compile_context>

<pallas_src>
import functools

import jax
import jax.numpy as jnp
from jax.experimental import pallas as pl
from jax.experimental.pallas import tpu as pltpu

SCALED_SILU_FACTOR = 1.0 / 0.6  # GemNet ScaledSiLU


def _round_up(x, m):
    return (x + m - 1) // m * m


def _vmem_limit_bytes():
    """Per-generation VMEM budget: ~85% of physical capacity.

    ~108 MiB on 128 MiB parts (v5e/v6e), ~54 MiB on v7x's 64 MiB per-core VMEM.
    Falls back to a conservative 64 MiB if the query is unavailable.
    """
    fallback = 64 * 1024 * 1024
    try:
        cap = int(getattr(pltpu.get_tpu_info(), "vmem_capacity_bytes", fallback))
    except Exception:
        cap = fallback
    if cap <= 0:
        cap = fallback
    return max(32 * 1024 * 1024, int(cap * 0.85))


def _pick_edge_tile(n_edges, two_n_atoms, e_feat, out_pad, rbf_itemsize,
                    compute_itemsize, out_itemsize, vmem_limit, tile_edges):
    """Largest edge tile whose estimated VMEM working set fits ~75% of the limit."""
    budget = int(vmem_limit * 0.75)
    # Resident tables counted at 2x (Pallas double-buffers blocked operands).
    # TODO(synk): single-buffer the constant tables (memory_space=VMEM /
    #             pl.Buffered(1)) to halve this term once large atom tables
    #             become the binding constraint on v7x.
    table_bytes = 2 * (two_n_atoms + e_feat) * out_pad * compute_itemsize

    candidates = [512, 256, 128, 64, 32, 16, 8]
    if tile_edges is not None:
        candidates = [t for t in candidates if t <= int(tile_edges)] or [8]

    tile = 8
    for t in candidates:
        per_tile = (
            2 * 2 * (t * 4)                              # idx_s / idx_t tiles (x2 buffers)
            + 2 * t * e_feat * rbf_itemsize              # m_rbf tile (x2 buffers)
            + 2 * t * out_pad * out_itemsize             # output tile (x2 buffers)
            + t * two_n_atoms * (4 + compute_itemsize)   # iota + selector intermediates
            + t * out_pad * 4                            # f32 accumulator
        )
        if table_bytes + per_tile <= budget:
            tile = t
            break

    # Keep every block dim <= the corresponding array dim (last partial block is
    # still handled by Pallas' boundary masking).
    if n_edges >= 8:
        tile = min(tile, (n_edges // 8) * 8)
    else:
        tile = n_edges
    return max(tile, 1)


def _edge_embedding_kernel(idx_s_ref, idx_t_ref, rbf_ref, hw_ref, wr_ref, out_ref,
                           *, n_atoms, activation):
    tile = out_ref.shape[0]
    two_n = hw_ref.shape[0]          # 2 * n_atoms
    cdt = hw_ref.dtype               # MXU compute dtype (bf16 for bf16 models)

    # Pair "one-hot" selector: row e has a 1 at column idx_s[e] and at
    # n_atoms + idx_t[e].  Note: out-of-range indices silently select nothing
    # (contribute zero) instead of faulting like a real gather would.
    col = jax.lax.broadcasted_iota(jnp.int32, (tile, two_n), 1)
    sel = jnp.logical_or(col == idx_s_ref[...],
                         col == (idx_t_ref[...] + n_atoms))
    pair_sel = sel.astype(jnp.float32).astype(cdt)       # exact 0/1 in any dtype

    # Atom contribution: hw[idx_s] + hw[n_atoms + idx_t] realised as ONE MXU
    # matmul against the resident folded table (exact one-hot row selection).
    atom_part = jnp.dot(pair_sel, hw_ref[...], preferred_element_type=jnp.float32)
    # Edge-feature contribution of the concat-matmul.  (Two dots joined by a
    # VPU add, both accumulating in f32 - no claim of a fused MXU acc chain.)
    rbf_part = jnp.dot(rbf_ref[...].astype(cdt), wr_ref[...],
                       preferred_element_type=jnp.float32)
    acc = atom_part + rbf_part

    if activation in ("silu", "swish"):
        acc = jax.nn.silu(acc) * SCALED_SILU_FACTOR
    # activation is None -> identity

    out_ref[...] = acc.astype(out_ref.dtype)


def edge_embedding(h, m_rbf, idx_s, idx_t, weight, *, activation="silu",
                   tile_edges=None, compute_dtype=None, out_dtype=None):
    """Pallas EdgeEmbedding forward.

    h:      (nAtoms, atom_features)
    m_rbf:  (nEdges, edge_features)
    idx_s:  (nEdges,) int
    idx_t:  (nEdges,) int
    weight: (2*atom_features + edge_features, out_features)    # x @ W layout
    compute_dtype: MXU operand dtype (default: h.dtype; pass jnp.bfloat16 for
                   full-rate MXU + half-size resident table when tolerable)
    out_dtype:     output dtype (default: h.dtype; bf16 halves HBM write traffic)
    returns (nEdges, out_features)
    """
    if activation not in (None, "silu", "swish"):
        raise NotImplementedError(f"activation {activation!r} not supported")

    n_atoms, a_feat = h.shape
    n_edges, e_feat = m_rbf.shape
    in_feat, out_feat = weight.shape
    assert in_feat == 2 * a_feat + e_feat

    compute_dtype = jnp.dtype(compute_dtype or h.dtype)
    out_dtype = jnp.dtype(out_dtype or h.dtype)

    # Split the concat weight into its three row blocks (one-time, tiny).
    w_s = weight[:a_feat]
    w_t = weight[a_feat:2 * a_feat]
    w_r = weight[2 * a_feat:]

    # Lane-dense output: pad out_features up to a multiple of 128 only when
    # it is not one already (no dead-column writes / slice copy otherwise).
    out_pad = _round_up(out_feat, 128)
    if out_pad != out_feat:
        pad_cols = ((0, 0), (0, out_pad - out_feat))
        w_s, w_t, w_r = [jnp.pad(w, pad_cols) for w in (w_s, w_t, w_r)]

    # Fold the atom half of the dense layer once (exact math at f32 HIGHEST;
    # note: rounding hw to a bf16 compute_dtype adds one extra rounding step
    # vs the reference single concat-matmul).
    hp = jax.lax.Precision.HIGHEST
    f32 = jnp.float32
    hw = jnp.concatenate(
        [jnp.dot(h.astype(f32), w_s.astype(f32), precision=hp),
         jnp.dot(h.astype(f32), w_t.astype(f32), precision=hp)],
        axis=0).astype(compute_dtype)                   # (2*n_atoms, out_pad)
    w_r = w_r.astype(compute_dtype)                     # (e_feat,     out_pad)
    two_n = 2 * n_atoms

    # Per-generation VMEM budget and budget-aware edge tile.
    vmem_limit = _vmem_limit_bytes()
    tile = _pick_edge_tile(n_edges, two_n, e_feat, out_pad,
                           m_rbf.dtype.itemsize, compute_dtype.itemsize,
                           out_dtype.itemsize, vmem_limit, tile_edges)
    num_tiles = pl.cdiv(n_edges, tile)

    # Indices as (nEdges, 1) int32 VMEM column vectors.  No edge-dim padding:
    # the last partial block is handled by Pallas boundary masking.
    idx_s = idx_s.astype(jnp.int32).reshape(n_edges, 1)
    idx_t = idx_t.astype(jnp.int32).reshape(n_edges, 1)

    # Megacore-shard the edge axis only when there is more than one tile, so
    # tiny graphs don't pay the resident-table DMA on both v7x TensorCores.
    dims = ("parallel",) if num_tiles > 1 else ("arbitrary",)

    kernel = functools.partial(_edge_embedding_kernel,
                               n_atoms=n_atoms, activation=activation)

    out = pl.pallas_call(
        kernel,
        out_shape=jax.ShapeDtypeStruct((n_edges, out_pad), out_dtype),
        grid=(num_tiles,),
        in_specs=[
            pl.BlockSpec((tile, 1), lambda i: (i, 0)),              # idx_s tile
            pl.BlockSpec((tile, 1), lambda i: (i, 0)),              # idx_t tile
            pl.BlockSpec((tile, e_feat), lambda i: (i, 0)),         # m_rbf tile
            pl.BlockSpec((two_n, out_pad), lambda i: (0, 0)),       # hw table (resident)
            pl.BlockSpec((e_feat, out_pad), lambda i: (0, 0)),      # W_rbf    (resident)
        ],
        out_specs=pl.BlockSpec((tile, out_pad), lambda i: (i, 0)),
        compiler_params=pltpu.CompilerParams(
            dimension_semantics=dims,
            vmem_limit_bytes=vmem_limit,
        ),
    )(idx_s, idx_t, m_rbf, hw, w_r)

    if out_pad != out_feat:
        out = out[:, :out_feat]
    return out


def edge_embedding_ref(h, m_rbf, idx_s, idx_t, weight, *, activation="silu"):
    """Pure-JAX reference (mirrors the PyTorch module)."""
    h_s = h[idx_s]
    h_t = h[idx_t]
    m_st = jnp.concatenate([h_s, h_t, m_rbf], axis=-1)
    out = jnp.dot(m_st, weight, precision=jax.lax.Precision.HIGHEST)
    if activation in ("silu", "swish"):
        out = jax.nn.silu(out) * SCALED_SILU_FACTOR
    return out


if __name__ == "__main__":
    key = jax.random.PRNGKey(0)
    (k_h, k_rbf, k_s, k_t, k_w,
     k2_h, k2_rbf, k2_s, k2_t, k2_w) = jax.random.split(key, 10)

    # ---- Test 1: f32, small module-consistent shapes, ragged n_edges --------
    n_atoms, atom_features, edge_features, out_features = 16, 32, 16, 32
    n_edges = 100  # not a multiple of the tile -> exercises partial-block path

    h = jax.random.normal(k_h, (n_atoms, atom_features), dtype=jnp.float32)
    m_rbf = jax.random.normal(k_rbf, (n_edges, edge_features), dtype=jnp.float32)
    idx_s = jax.random.randint(k_s, (n_edges,), 0, n_atoms, dtype=jnp.int32)
    idx_t = jax.random.randint(k_t, (n_edges,), 0, n_atoms, dtype=jnp.int32)
    in_features = 2 * atom_features + edge_features
    weight = jax.random.normal(k_w, (in_features, out_features),
                               dtype=jnp.float32) / jnp.sqrt(in_features)

    out = jax.block_until_ready(
        edge_embedding(h, m_rbf, idx_s, idx_t, weight, activation="silu"))
    ref = edge_embedding_ref(h, m_rbf, idx_s, idx_t, weight, activation="silu")
    assert out.shape == (n_edges, out_features)
    assert jnp.allclose(out, ref, atol=1e-4, rtol=1e-4), "f32 mismatch vs reference"

    # ---- Test 2: bf16 in/out, multi-tile grid, 128-wide output (no lane pad) -
    n_atoms2, a_feat2, e_feat2, out_feat2, n_edges2 = 40, 64, 16, 128, 1000
    h2 = jax.random.normal(k2_h, (n_atoms2, a_feat2), jnp.float32).astype(jnp.bfloat16)
    m_rbf2 = jax.random.normal(k2_rbf, (n_edges2, e_feat2), jnp.float32).astype(jnp.bfloat16)
    idx_s2 = jax.random.randint(k2_s, (n_edges2,), 0, n_atoms2, dtype=jnp.int32)
    idx_t2 = jax.random.randint(k2_t, (n_edges2,), 0, n_atoms2, dtype=jnp.int32)
    in_feat2 = 2 * a_feat2 + e_feat2
    w2 = (jax.random.normal(k2_w, (in_feat2, out_feat2), jnp.float32)
          / jnp.sqrt(in_feat2)).astype(jnp.bfloat16)

    out2 = jax.block_until_ready(
        edge_embedding(h2, m_rbf2, idx_s2, idx_t2, w2, activation="silu"))
    ref2 = edge_embedding_ref(h2.astype(jnp.float32), m_rbf2.astype(jnp.float32),
                              idx_s2, idx_t2, w2.astype(jnp.float32),
                              activation="silu")
    assert out2.shape == (n_edges2, out_feat2)
    assert out2.dtype == jnp.bfloat16
    assert jnp.allclose(out2.astype(jnp.float32), ref2, atol=0.1, rtol=0.1), \
        "bf16 mismatch vs reference"

    print("KERNEL_OK")
</pallas_src>

<mosaic_0001>
module attributes {stable_mosaic.version = 11 : i64} {
  func.func @_edge_embedding_kernel(%arg0: i32, %arg1: memref<96x1xi32, #tpu.memory_space<vmem>>, %arg2: memref<96x1xi32, #tpu.memory_space<vmem>>, %arg3: memref<96x16xf32, #tpu.memory_space<vmem>>, %arg4: memref<32x128xf32, #tpu.memory_space<vmem>>, %arg5: memref<16x128xf32, #tpu.memory_space<vmem>>, %arg6: memref<96x128xf32, #tpu.memory_space<vmem>>) attributes {dimension_semantics = [#tpu.dimension_semantics<parallel>], iteration_bounds = array<i64: 2>, scalar_prefetch = 0 : i64, scratch_operands = 0 : i64, tpu.core_type = #tpu.core_type<tc>, window_params = [{transform_indices = @transform_0, window_bounds = array<i64: 96, 1>}, {transform_indices = @transform_1, window_bounds = array<i64: 96, 1>}, {transform_indices = @transform_2, window_bounds = array<i64: 96, 16>}, {pipeline_mode = #tpu.pipeline_mode<synchronous>, transform_indices = @transform_3, window_bounds = array<i64: 32, 128>}, {pipeline_mode = #tpu.pipeline_mode<synchronous>, transform_indices = @transform_4, window_bounds = array<i64: 16, 128>}, {transform_indices = @transform_5, window_bounds = array<i64: 96, 128>}]} {
    %0 = tpu.iota {dimensions = array<i32: 1>} : vector<96x32xi32>
    %c0 = arith.constant 0 : index
    %c0_0 = arith.constant 0 : index
    %1 = vector.load %arg1[%c0, %c0_0] : memref<96x1xi32, #tpu.memory_space<vmem>>, vector<96x1xi32>
    %2 = vector.broadcast %1 : vector<96x1xi32> to vector<96x32xi32>
    %3 = arith.cmpi eq, %0, %2 : vector<96x32xi32>
    %c0_1 = arith.constant 0 : index
    %c0_2 = arith.constant 0 : index
    %4 = vector.load %arg2[%c0_1, %c0_2] : memref<96x1xi32, #tpu.memory_space<vmem>>, vector<96x1xi32>
    %c16_i32 = arith.constant 16 : i32
    %5 = vector.broadcast %c16_i32 : i32 to vector<96x1xi32>
    %6 = arith.addi %4, %5 : vector<96x1xi32>
    %7 = vector.broadcast %6 : vector<96x1xi32> to vector<96x32xi32>
    %8 = arith.cmpi eq, %0, %7 : vector<96x32xi32>
    %9 = arith.ori %3, %8 : vector<96x32xi1>
    %10 = arith.extui %9 : vector<96x32xi1> to vector<96x32xi32>
    %11 = arith.sitofp %10 : vector<96x32xi32> to vector<96x32xf32>
    %c0_3 = arith.constant 0 : index
    %c0_4 = arith.constant 0 : index
    %12 = vector.load %arg4[%c0_3, %c0_4] : memref<32x128xf32, #tpu.memory_space<vmem>>, vector<32x128xf32>
    %cst = arith.constant dense<0.000000e+00> : vector<96x128xf32>
    %13 = tpu.matmul %11, %12, %cst {dimension_numbers = #tpu.dot_dimension_numbers<[1], [0], [0], [1], [0, 0, 1, 1], [], []>} : vector<96x32xf32>, vector<32x128xf32>, vector<96x128xf32> -> vector<96x128xf32>
    %c0_5 = arith.constant 0 : index
    %c0_6 = arith.constant 0 : index
    %14 = vector.load %arg3[%c0_5, %c0_6] : memref<96x16xf32, #tpu.memory_space<vmem>>, vector<96x16xf32>
    %c0_7 = arith.constant 0 : index
    %c0_8 = arith.constant 0 : index
    %15 = vector.load %arg5[%c0_7, %c0_8] : memref<16x128xf32, #tpu.memory_space<vmem>>, vector<16x128xf32>
    %cst_9 = arith.constant dense<0.000000e+00> : vector<96x128xf32>
    %16 = tpu.matmul %14, %15, %cst_9 {dimension_numbers = #tpu.dot_dimension_numbers<[1], [0], [0], [1], [0, 0, 1, 1], [], []>} : vector<96x16xf32>, vector<16x128xf32>, vector<96x128xf32> -> vector<96x128xf32>
    %17 = arith.addf %13, %16 : vector<96x128xf32>
    %18 = arith.negf %17 : vector<96x128xf32>
    %19 = math.exp %18 : vector<96x128xf32>
    %cst_10 = arith.constant 1.000000e+00 : f32
    %20 = vector.broadcast %cst_10 : f32 to vector<96x128xf32>
    %21 = arith.addf %20, %19 : vector<96x128xf32>
    %22 = arith.divf %20, %21 : vector<96x128xf32>
    %23 = arith.mulf %17, %22 : vector<96x128xf32>
    %cst_11 = arith.constant 1.66666663 : f32
    %24 = vector.broadcast %cst_11 : f32 to vector<96x128xf32>
    %25 = arith.mulf %23, %24 : vector<96x128xf32>
    %c0_12 = arith.constant 0 : index
    %c0_13 = arith.constant 0 : index
    %26 = vector.load %arg6[%c0_12, %c0_13] : memref<96x128xf32, #tpu.memory_space<vmem>>, vector<96x128xf32>
    tpu.vector_store %arg6[%c0_12, %c0_13], %25 {strides = array<i32>} : memref<96x128xf32, #tpu.memory_space<vmem>>, vector<96x128xf32>,
    return
  }
  func.func @transform_0(%arg0: i32) -> (i32, i32) {
    %c0_i32 = arith.constant 0 : i32
    %c0_i32_0 = arith.constant 0 : i32
    return %arg0, %c0_i32 : i32, i32
  }
  func.func @transform_1(%arg0: i32) -> (i32, i32) {
    %c0_i32 = arith.constant 0 : i32
    %c0_i32_0 = arith.constant 0 : i32
    return %arg0, %c0_i32 : i32, i32
  }
  func.func @transform_2(%arg0: i32) -> (i32, i32) {
    %c0_i32 = arith.constant 0 : i32
    %c0_i32_0 = arith.constant 0 : i32
    return %arg0, %c0_i32 : i32, i32
  }
  func.func @transform_3(%arg0: i32) -> (i32, i32) {
    %c0_i32 = arith.constant 0 : i32
    %c0_i32_0 = arith.constant 0 : i32
    %c0_i32_1 = arith.constant 0 : i32
    return %c0_i32, %c0_i32_0 : i32, i32
  }
  func.func @transform_4(%arg0: i32) -> (i32, i32) {
    %c0_i32 = arith.constant 0 : i32
    %c0_i32_0 = arith.constant 0 : i32
    %c0_i32_1 = arith.constant 0 : i32
    return %c0_i32, %c0_i32_0 : i32, i32
  }
  func.func @transform_5(%arg0: i32) -> (i32, i32) {
    %c0_i32 = arith.constant 0 : i32
    %c0_i32_0 = arith.constant 0 : i32
    return %arg0, %c0_i32 : i32, i32
  }
}

</mosaic_0001>

<bundles_post_ra>
// kernel: tpu_custom_call.1
= control target key start
LH: loop header
LB: loop body
LE: loop exit
PB: predicated region body
PF: predicated region fallthrough
CT: control target
= control target key end

     0   :  { %10 = vsyncpa [#allocation3], 0  ;;  %s1698_s0 = inlined_call_operand.vmem [shape: s32[100,1], index: 0, kind: input, shape index: {}]   ;;  %s1699_s1 = inlined_call_operand.vmem [shape: s32[100,1], index: 1, kind: input, shape index: {}]   ;;  %s1700_s2 = inlined_call_operand.vmem [shape: f32[100,16], index: 2, kind: input, shape index: {}]   ;;  %s1701_s3 = inlined_call_operand.vmem [shape: f32[32,128], index: 3, kind: input, shape index: {}]   ;;  %s1702_s4 = inlined_call_operand.vmem [shape: f32[16,128], index: 4, kind: input, shape index: {}]   ;;  %s1703_s5 = inlined_call_operand.hbm [shape: f32[100,128], index: 5, kind: output, shape index: {}]  }
   0x1   :  { %12 = vsyncpa [#allocation3 + $0x1], 0  ;;  %s1391_s18 = smov 0   ;;  %s1393_s19 = smov 0  }
   0x2   :  { %s1395_s20 = smov 0   ;;  %s1397_s21 = smov 0  }
   0x3 LB: > { %s1412_s22 = sadd.s32 4294967295, %s1354_s21   ;;  %s1060_s23 = sadd.s32 4294967294, %s1354_s21   ;;  %s1354_s21 = sphi %s1397_s21, %s1709_s21   ;;  %s1350_s20 = sphi %s1395_s20, %s1708_s20   ;;  %s1346_s19 = sphi %s1393_s19, %s1707_s19   ;;  %s1342_s18 = sphi %s1391_s18, %s1706_s18  }
   0x4   : > { %s1416_s24 = sadd.s32 1, %s1354_s21   ;;  %s145_s25 = sadd.s32 1, %s1350_s20 }
   0x5   : > { %s142_s26 = ssub.s32 %s1354_s21, %s1416_s24  ;;  %p155_p0 = scmp.ne.s32.totalorder %s1350_s20, %s1346_s19 }
   0x6   : > { %p143_p1 = scmp.eq.s32.totalorder %s142_s26, 0  ;;  %p156_p2 = scmp.eq.s32.totalorder %s1412_s22, 1 }
   0x7   : > { %p161_p3 = scmp.ne.s32.totalorder %s1346_s19, %s1342_s18  ;;  %p162_p4 = scmp.eq.s32.totalorder %s1060_s23, 1 }
   0x8   : > { %s1427_s27 = scalar_select %p143_p1, %s1350_s20, %s145_s25  }
   0x9   : > { %p1429_p5 = por %p156_p2, %p155_p0  ;;  %p1433_p6 = por %p162_p4, %p161_p3 }
   0xa   : > { %p1063_p7 = scmp.ge.s32.totalorder %s1354_s21, 1  ;;  %p237_p8 = scmp.lt.s32.totalorder %s1354_s21, 3 }
   0xc   : > { %p238_p9 = pnand %p1063_p7, %p237_p8 }
   0xd   : > { %s1440_s30 = smul.u32 (!%p238_p9), 12, %s1412_s22 }
   0xe   : > { %241 = sbr.rel (%p238_p9) target bundleno = 456 (0x1c8), region = 40 }
   0xf   : > { %p292_p10 = scmp.lt.s32.totalorder (!%p238_p9), %s1440_s30, 12 }
  0x13   : > { %v1356_v0 = vmov 0   ;;  %s293_s6 = scalar_select %p292_p10, %s1440_s30, 12  ;;  %v507_v11 = vld [vmem:[%s1701_s3 + $0x18] sm:$0xff]  ;;  %v521_v12 = vld [vmem:[%s1702_s4 + $0x8] sm:$0xff]  ;;  %v506_v14 = vld [vmem:[%s1701_s3 + $0x10] sm:$0xff]  ;;  %vm522_vm0 = vcmask 130048   ;;  %v334_v55 = vlaneseq }
  0x14   : > { %1245 = vset.pattern.permute.xlu1 %v1356_v0  ;;  %1244 = vset.pattern.permute.xlu0 %v1356_v0  ;;  %v520_v15 = vld [vmem:[%s1702_s4] sm:$0xff]  ;;  %v505_v18 = vld [vmem:[%s1701_s3 + $0x8] sm:$0xff]  ;;  %vm684_vm9 = vcmask 261120   ;;  %v1357_v0 = vmov 0.0   ;;  %s963_s23 = ssub.s32 (%p1429_p5), 13, %s1440_s30 }
  0x15   : > { %s1064_s7 = sshll.u32 %s293_s6, 3  ;;  %1175 = vmatprep.subr.mxu1 %v507_v11  ;;  %1153 = vmatprep.subr.mxu0 %v521_v12  ;;  %v504_v24 = vld [vmem:[%s1701_s3] sm:$0xff]  ;;  %v1525_v58 = vand.u32 127, %v334_v55  ;;  %p964_p11 = scmp.lt.s32.totalorder (%p1429_p5), %s963_s23, 12 }
  0x16   : > { %s1447_s10 = scalar_lea.vmem %s1698_s0, %s1064_s7  ;;  %s1452_s13 = scalar_lea.vmem %s1699_s1, %s1064_s7  ;;  %1176 = vmatpush3.msra.mxu1 %v507_v11  ;;  %1154 = vmatpush3.msra.mxu0 %v521_v12 }
  0x17   : > { %v337_v1 = vld [vmem:[%s1447_s10 + $0x8] sm:$0xff]  ;;  %v336_v2 = vld [vmem:[%s1447_s10] sm:$0xff]  ;;  %v338_v5 = vld [vmem:[%s1447_s10 + $0x10] sm:$0xff]  ;;  %s1476_s11 = scalar_lea.vmem %s1700_s2, %s1064_s7  ;;  %1177 = vmatprep.subr.mxu1 %v506_v14  ;;  %1155 = vmatprep.subr.mxu0 %v520_v15 }
  0x18   : > { %v397_v3 = vld [vmem:[%s1452_s13 + $0x8] sm:$0xff]  ;;  %352 = vperm.xlu1 %1245, %v337_v1   ;;  %349 = vperm.xlu0 %1244, %v336_v2   ;;  %v398_v6 = vld [vmem:[%s1452_s13 + $0x10] sm:$0xff]  ;;  %v396_v7 = vld [vmem:[%s1452_s13] sm:$0xff] }
  0x19   : > { %v409_v4 = vadd.s32 16, %v397_v3  ;;  %v410_v8 = vadd.s32 16, %v398_v6  ;;  %v408_v9 = vadd.s32 16, %v396_v7  ;;  %v399_v10 = vld [vmem:[%s1452_s13 + $0x18] sm:$0xff]  ;;  %v400_v17 = vld [vmem:[%s1452_s13 + $0x20] sm:$0xff]  ;;  %v509_v21 = vld [vmem:[%s1476_s11 + $0x8] sm:$0xff]  ;;  %1178 = vmatpush3.msra.mxu1 %v506_v14  ;;  %1156 = vmatpush3.msra.mxu0 %v520_v15 }
  0x1a   : > { %v411_v13 = vadd.s32 16, %v399_v10  ;;  %v339_v16 = vld [vmem:[%s1447_s10 + $0x18] sm:$0xff]  ;;  %v508_v19 = vld [vmem:[%s1476_s11] sm:$0xff]  ;;  %v412_v20 = vadd.s32 16, %v400_v17  ;;  %v401_v23 = vld [vmem:[%s1452_s13 + $0x28] sm:$0xff]  ;;  %1179 = vmatprep.subr.mxu1 %v505_v18 }
  0x1b   : > { %v340_v22 = vld [vmem:[%s1447_s10 + $0x20] sm:$0xff]  ;;  %1157 = vmatprep.mubr.msk.f32.mxu0 %vm522_vm0, %v508_v19  ;;  %v510_v25 = vld [vmem:[%s1476_s11 + $0x10] sm:$0xff]  ;;  %1180 = vmatpush3.msra.mxu1 %v505_v18  ;;  %v413_v26 = vadd.s32 16, %v401_v23  ;;  %v511_v27 = vld [vmem:[%s1476_s11 + $0x18] sm:$0xff] }
  0x1c   : > { %424 = vperm.xlu1 %1245, %v409_v4   ;;  %355 = vperm.xlu0 %1244, %v338_v5   ;;  %v341_v28 = vld [vmem:[%s1447_s10 + $0x28] sm:$0xff]  ;;  %v402_v29 = vld [vmem:[%s1452_s13 + $0x30] sm:$0xff]  ;;  %v512_v30 = vld [vmem:[%s1476_s11 + $0x20] sm:$0xff] }
  0x1d   : > { %1158 = vmatmul.mubr.msk.f32.vlgmr.msra.gmra.mxu0 %vm522_vm0, %v509_v21  ;;  %1181 = vmatprep.subr.mxu1 %v504_v24  ;;  %v414_v31 = vadd.s32 16, %v402_v29  ;;  %v513_v32 = vld [vmem:[%s1476_s11 + $0x28] sm:$0xff]  ;;  %v342_v33 = vld [vmem:[%s1447_s10 + $0x30] sm:$0xff]  ;;  %v403_v34 = vld [vmem:[%s1452_s13 + $0x38] sm:$0xff] }
  0x1e   : > { %1160 = vmatprep.mubr.msk.f32.mxu0 %vm522_vm0, %v510_v25  ;;  %1182 = vmatpush3.msra.mxu1 %v504_v24  ;;  %v415_v35 = vadd.s32 16, %v403_v34  ;;  %v343_v36 = vld [vmem:[%s1447_s10 + $0x38] sm:$0xff]  ;;  %v404_v37 = vld [vmem:[%s1452_s13 + $0x40] sm:$0xff]  ;;  %v514_v38 = vld [vmem:[%s1476_s11 + $0x30] sm:$0xff] }
  0x1f   : > { %v515_v39 = vld [vmem:[%s1476_s11 + $0x38] sm:$0xff]  ;;  %v416_v40 = vadd.s32 16, %v404_v37  ;;  %v344_v41 = vld [vmem:[%s1447_s10 + $0x40] sm:$0xff]  ;;  %v405_v42 = vld [vmem:[%s1452_s13 + $0x48] sm:$0xff] }
  0x20   : > { %427 = vperm.xlu1 %1245, %v410_v8   ;;  %421 = vperm.xlu0 %1244, %v408_v9   ;;  %v417_v43 = vadd.s32 16, %v405_v42  ;;  %v345_v44 = vld [vmem:[%s1447_s10 + $0x48] sm:$0xff]  ;;  %v406_v45 = vld [vmem:[%s1452_s13 + $0x50] sm:$0xff]  ;;  %v516_v46 = vld [vmem:[%s1476_s11 + $0x40] sm:$0xff] }
  0x21   : > { %1161 = vmatmul.mubr.msk.f32.gmra.mxu0 %vm522_vm0, %v511_v27  ;;  %v517_v47 = vld [vmem:[%s1476_s11 + $0x48] sm:$0xff]  ;;  %v418_v48 = vadd.s32 16, %v406_v45  ;;  %v346_v49 = vld [vmem:[%s1447_s10 + $0x50] sm:$0xff]  ;;  %v407_v50 = vld [vmem:[%s1452_s13 + $0x58] sm:$0xff] }
  0x22   : > { %1163 = vmatprep.mubr.msk.f32.mxu0 %vm522_vm0, %v512_v30  ;;  %v419_v51 = vadd.s32 16, %v407_v50  ;;  %v518_v52 = vld [vmem:[%s1476_s11 + $0x50] sm:$0xff]  ;;  %v347_v53 = vld [vmem:[%s1447_s10 + $0x58] sm:$0xff]  ;;  %s284_s10 = sand.u32 1, %s1346_s19  }
  0x23   : > { %v519_v54 = vld [vmem:[%s1476_s11 + $0x58] sm:$0xff]  ;;  %s1201_s13 = smul.u32 96, %s284_s10  ;;  %s1638_s17 = scalar_lea.sflag [#allocation3], %s284_s10 }
  0x24   : > { %430 = vperm.xlu1 %1245, %v411_v13   ;;  %358 = vperm.xlu0 %1244, %v339_v16  }
  0x25   : > { %1164 = vmatmul.mubr.msk.f32.gmra.mxu0 %vm522_vm0, %v513_v32  ;;  %s1613_s16 = scalar_lea.vmem [#allocation2], %s1201_s13 }
  0x26   : > { %1166 = vmatprep.mubr.msk.f32.mxu0 %vm522_vm0, %v514_v38 }
  0x28   : > { %433 = vperm.xlu1 %1245, %v412_v20   ;;  %361 = vperm.xlu0 %1244, %v340_v22  }
  0x29   : > { %1167 = vmatmul.mubr.msk.f32.gmra.mxu0 %vm522_vm0, %v515_v39 }
  0x2a   : > { %1169 = vmatprep.mubr.msk.f32.mxu0 %vm522_vm0, %v516_v46 }
  0x2c   : > { %436 = vperm.xlu1 %1245, %v413_v26   ;;  %364 = vperm.xlu0 %1244, %v341_v28  }
  0x2d   : > { %1170 = vmatmul.mubr.msk.f32.gmra.mxu0 %vm522_vm0, %v517_v47 }
  0x2e   : > { %1172 = vmatprep.mubr.msk.f32.mxu0 %vm522_vm0, %v518_v52 }
  0x30   : > { %439 = vperm.xlu1 %1245, %v414_v31   ;;  %367 = vperm.xlu0 %1244, %v342_v33  }
  0x31   : > { %1173 = vmatmul.mubr.msk.f32.gmra.mxu0 %vm522_vm0, %v519_v54 }
  0x34   : > { %442 = vperm.xlu1 %1245, %v415_v35   ;;  %370 = vperm.xlu0 %1244, %v343_v36  }
  0x38   : > { %445 = vperm.xlu1 %1245, %v416_v40   ;;  %373 = vperm.xlu0 %1244, %v344_v41  }
  0x3c   : > { %448 = vperm.xlu1 %1245, %v417_v43   ;;  %376 = vperm.xlu0 %1244, %v345_v44  }
  0x40   : > { %451 = vperm.xlu1 %1245, %v418_v48   ;;  %379 = vperm.xlu0 %1244, %v346_v49  }
  0x44   : > { %454 = vperm.xlu1 %1245, %v419_v51   ;;  %382 = vperm.xlu0 %1244, %v347_v53  }
  0x93   : > { %v353_v56 = vpop.permute.xlu1 %352  ;;  %v350_v57 = vpop.permute.xlu0 %349 }
  0x94   : > { %vm385_vm2 = vcmp.eq.s32.totalorder %v1525_v58, %v353_v56  ;;  %vm384_vm7 = vcmp.eq.s32.totalorder %v1525_v58, %v350_v57 }
  0x97   : > { %v425_v59 = vpop.permute.xlu1 %424  ;;  %v356_v60 = vpop.permute.xlu0 %355 }
  0x98   : > { %vm457_vm1 = vcmp.eq.s32.totalorder %v1525_v58, %v425_v59  ;;  %vm386_vm4 = vcmp.eq.s32.totalorder %v1525_v58, %v356_v60 }
  0x99   : > { %vm469_vm3 = vmor %vm385_vm2, %vm457_vm1 }
  0x9a   : > { %v1068_v3 = vsel %vm469_vm3, 1.0, %v1357_v0 }
  0x9b   : > { %v428_v61 = vpop.permute.xlu1 %427  ;;  %v422_v62 = vpop.permute.xlu0 %421 }
  0x9c   : > { %vm458_vm5 = vcmp.eq.s32.totalorder %v1525_v58, %v428_v61  ;;  %vm456_vm6 = vcmp.eq.s32.totalorder %v1525_v58, %v422_v62 }
  0x9d   : > { %vm470_vm8 = vmor %vm386_vm4, %vm458_vm5 }
  0x9e   : > { %vm468_vm10 = vmor %vm384_vm7, %vm456_vm6  ;;  %v1069_v4 = vsel %vm470_vm8, 1.0, %v1357_v0 }
  0x9f   : > { %v431_v63 = vpop.permute.xlu1 %430  ;;  %v1067_v1 = vsel %vm468_vm10, 1.0, %v1357_v0  ;;  %v359_v2 = vpop.permute.xlu0 %358 }
  0xa0   : > { %vm459_vm11 = vcmp.eq.s32.totalorder %v1525_v58, %v431_v63  ;;  %1183 = vmatprep.mubr.msk.f32.mxu1 %vm684_vm9, %v1067_v1  ;;  %vm387_vm12 = vcmp.eq.s32.totalorder %v1525_v58, %v359_v2 }
  0xa1   : > { %vm471_vm13 = vmor %vm387_vm12, %vm459_vm11  ;;  %1184 = vmatmul.mubr.msk.f32.vlgmr.msra.gmra.mxu1 %vm684_vm9, %v1068_v3 }
  0xa2   : > { %v1070_v5 = vsel %vm471_vm13, 1.0, %v1357_v0  ;;  %1186 = vmatprep.mubr.msk.f32.mxu1 %vm684_vm9, %v1069_v4 }
  0xa3   : > { %v434_v6 = vpop.permute.xlu1 %433  ;;  %v362_v7 = vpop.permute.xlu0 %361 }
  0xa4   : > { %vm460_vm14 = vcmp.eq.s32.totalorder %v1525_v58, %v434_v6  ;;  %vm388_vm15 = vcmp.eq.s32.totalorder %v1525_v58, %v362_v7 }
  0xa5   : > { %vm472_vm0 = vmor %vm388_vm15, %vm460_vm14  ;;  %1187 = vmatmul.mubr.msk.f32.gmra.mxu1 %vm684_vm9, %v1070_v5 }
  0xa6   : > { %v1071_v8 = vsel %vm472_vm0, 1.0, %v1357_v0 }
  0xa7   : > { %v437_v9 = vpop.permute.xlu1 %436  ;;  %1189 = vmatprep.mubr.msk.f32.mxu1 %vm684_vm9, %v1071_v8  ;;  %v365_v10 = vpop.permute.xlu0 %364 }
  0xa8   : > { %vm461_vm1 = vcmp.eq.s32.totalorder %v1525_v58, %v437_v9  ;;  %vm389_vm2 = vcmp.eq.s32.totalorder %v1525_v58, %v365_v10 }
  0xa9   : > { %vm473_vm3 = vmor %vm389_vm2, %vm461_vm1 }
  0xaa   : > { %v1072_v11 = vsel %vm473_vm3, 1.0, %v1357_v0 }
  0xab   : > { %v440_v12 = vpop.permute.xlu1 %439  ;;  %1190 = vmatmul.mubr.msk.f32.gmra.mxu1 %vm684_vm9, %v1072_v11  ;;  %v368_v13 = vpop.permute.xlu0 %367 }
  0xac   : > { %vm462_vm4 = vcmp.eq.s32.totalorder %v1525_v58, %v440_v12  ;;  %vm390_vm5 = vcmp.eq.s32.totalorder %v1525_v58, %v368_v13 }
  0xad   : > { %vm474_vm6 = vmor %vm390_vm5, %vm462_vm4 }
  0xae   : > { %v1073_v14 = vsel %vm474_vm6, 1.0, %v1357_v0 }
  0xaf   : > { %v443_v15 = vpop.permute.xlu1 %442  ;;  %1192 = vmatprep.mubr.msk.f32.mxu1 %vm684_vm9, %v1073_v14  ;;  %v371_v16 = vpop.permute.xlu0 %370 }
  0xb0   : > { %vm463_vm7 = vcmp.eq.s32.totalorder %v1525_v58, %v443_v15  ;;  %vm391_vm8 = vcmp.eq.s32.totalorder %v1525_v58, %v371_v16 }
  0xb1   : > { %vm475_vm10 = vmor %vm391_vm8, %vm463_vm7 }
  0xb2   : > { %v1074_v17 = vsel %vm475_vm10, 1.0, %v1357_v0 }
  0xb3   : > { %v446_v18 = vpop.permute.xlu1 %445  ;;  %1193 = vmatmul.mubr.msk.f32.gmra.mxu1 %vm684_vm9, %v1074_v17  ;;  %v374_v19 = vpop.permute.xlu0 %373 }
  0xb4   : > { %vm464_vm11 = vcmp.eq.s32.totalorder %v1525_v58, %v446_v18  ;;  %vm392_vm12 = vcmp.eq.s32.totalorder %v1525_v58, %v374_v19 }
  0xb5   : > { %vm476_vm13 = vmor %vm392_vm12, %vm464_vm11 }
  0xb6   : > { %v1075_v20 = vsel %vm476_vm13, 1.0, %v1357_v0 }
  0xb7   : > { %v449_v21 = vpop.permute.xlu1 %448  ;;  %1195 = vmatprep.mubr.msk.f32.mxu1 %vm684_vm9, %v1075_v20  ;;  %v377_v22 = vpop.permute.xlu0 %376 }
  0xb8   : > { %vm465_vm14 = vcmp.eq.s32.totalorder %v1525_v58, %v449_v21  ;;  %vm393_vm15 = vcmp.eq.s32.totalorder %v1525_v58, %v377_v22 }
  0xb9   : > { %vm477_vm0 = vmor %vm393_vm15, %vm465_vm14 }
  0xba   : > { %v1076_v23 = vsel %vm477_vm0, 1.0, %v1357_v0 }
  0xbb   : > { %v452_v24 = vpop.permute.xlu1 %451  ;;  %1196 = vmatmul.mubr.msk.f32.gmra.mxu1 %vm684_vm9, %v1076_v23  ;;  %v380_v25 = vpop.permute.xlu0 %379 }
  0xbc   : > { %vm466_vm1 = vcmp.eq.s32.totalorder %v1525_v58, %v452_v24  ;;  %vm394_vm2 = vcmp.eq.s32.totalorder %v1525_v58, %v380_v25 }
  0xbd   : > { %vm478_vm3 = vmor %vm394_vm2, %vm466_vm1 }
  0xbe   : > { %v1077_v26 = vsel %vm478_vm3, 1.0, %v1357_v0 }
  0xbf   : > { %v455_v27 = vpop.permute.xlu1 %454  ;;  %1198 = vmatprep.mubr.msk.f32.mxu1 %vm684_vm9, %v1077_v26  ;;  %v383_v28 = vpop.permute.xlu0 %382 }
  0xc0   : > { %vm467_vm4 = vcmp.eq.s32.totalorder %v1525_v58, %v455_v27  ;;  %vm395_vm5 = vcmp.eq.s32.totalorder %v1525_v58, %v383_v28 }
  0xc1   : > { %vm479_vm6 = vmor %vm395_vm5, %vm467_vm4 }
  0xc2   : > { %v1078_v29 = vsel %vm479_vm6, 1.0, %v1357_v0 }
  0xc3   : > { %1199 = vmatmul.mubr.msk.f32.gmra.mxu1 %vm684_vm9, %v1078_v29 }
  0xdd   : > { %v1159_v30 = vpop.f32.mrf.mxu0 }
  0xdf   : > { %v625_v31 = vpop.f32.mrf.mxu0 }
  0xe1   : > { %v1162_v33 = vpop.f32.mrf.mxu0 }
  0xe3   : > { %v635_v39 = vpop.f32.mrf.mxu0 }
  0xe5   : > { %v1165_v43 = vpop.f32.mrf.mxu0 }
  0xe7   : > { %v645_v48 = vpop.f32.mrf.mxu0 }
  0xe9   : > { %v1168_v53 = vpop.f32.mrf.mxu0 }
  0xeb   : > { %v655_v57 = vpop.f32.mrf.mxu0 }
  0xed   : > { %v1171_v2 = vpop.f32.mrf.mxu0 }
  0xef   : > { %v665_v8 = vpop.f32.mrf.mxu0 }
  0xf1   : > { %v1174_v18 = vpop.f32.mrf.mxu0 }
  0xf3   : > { %v675_v24 = vpop.f32.mrf.mxu0 }
 0x161   : > { %v1185_v32 = vpop.f32.mrf.mxu1 }
 0x162   : > { %v1576_v34 = vadd.f32 %v1185_v32, %v1159_v30 }
 0x163   : > { %v787_v35 = vpop.f32.mrf.mxu1 }
 0x164   : > { %v1104_v36 = vmul.f32 -1.442695, %v1576_v34  ;;  %v1579_v37 = vadd.f32 %v787_v35, %v625_v31 }
 0x165   : > { %v1188_v38 = vpop.f32.mrf.mxu1 }
 0x166   : > { %1246 = vpow2.f32 %v1104_v36  ;;  %v1103_v40 = vmul.f32 -1.442695, %v1579_v37  ;;  %v1582_v41 = vadd.f32 %v1188_v38, %v1162_v33 }
 0x167   : > { %v797_v42 = vpop.f32.mrf.mxu1 }
 0x168   : > { %1248 = vpow2.f32 %v1103_v40  ;;  %v1106_v44 = vmul.f32 -1.442695, %v1582_v41  ;;  %v1585_v45 = vadd.f32 %v797_v42, %v635_v39 }
 0x16a   : > { %1250 = vpow2.f32 %v1106_v44  ;;  %v1105_v46 = vmul.f32 -1.442695, %v1585_v45 }
 0x16b   : > { %v1191_v47 = vpop.f32.mrf.mxu1 }
 0x16c   : > { %1252 = vpow2.f32 %v1105_v46  ;;  %v1588_v49 = vadd.f32 %v1191_v47, %v1165_v43 }
 0x16d   : > { %v807_v50 = vpop.f32.mrf.mxu1 }
 0x16e   : > { %v1108_v51 = vmul.f32 -1.442695, %v1588_v49  ;;  %v1591_v52 = vadd.f32 %v807_v50, %v645_v48 }
 0x170   : > { %1254 = vpow2.f32 %v1108_v51  ;;  %v1107_v54 = vmul.f32 -1.442695, %v1591_v52 }
 0x172   : > { %1256 = vpow2.f32 %v1107_v54 }
 0x173   : > { %v1247_v55 = vpop.eup %1246  ;;  %v1194_v56 = vpop.f32.mrf.mxu1 }
 0x174   : > { %v883_v58 = vadd.f32 1.0, %v1247_v55  ;;  %v1594_v59 = vadd.f32 %v1194_v56, %v1168_v53 }
 0x175   : > { %v1249_v60 = vpop.eup %1248  ;;  %v817_v61 = vpop.f32.mrf.mxu1 }
 0x176   : > { %1258 = vrcp.f32 %v883_v58  ;;  %v882_v62 = vadd.f32 1.0, %v1249_v60  ;;  %v1110_v63 = vmul.f32 -1.442695, %v1594_v59  ;;  %v1597_v0 = vadd.f32 %v817_v61, %v655_v57 }
 0x177   : > { %v1251_v1 = vpop.eup %1250 }
 0x178   : > { %1260 = vrcp.f32 %v882_v62  ;;  %v885_v3 = vadd.f32 1.0, %v1251_v1  ;;  %v1109_v4 = vmul.f32 -1.442695, %v1597_v0 }
 0x179   : > { %v1253_v5 = vpop.eup %1252  ;;  %1262 = vpow2.f32 %v1110_v63 }
 0x17a   : > { %1264 = vrcp.f32 %v885_v3  ;;  %v884_v6 = vadd.f32 1.0, %v1253_v5 }
 0x17b   : > { %1266 = vpow2.f32 %v1109_v4  ;;  %v1197_v7 = vpop.f32.mrf.mxu1 }
 0x17c   : > { %1268 = vrcp.f32 %v884_v6  ;;  %v1600_v9 = vadd.f32 %v1197_v7, %v1171_v2 }
 0x17d   : > { %v1255_v10 = vpop.eup %1254  ;;  %v827_v11 = vpop.f32.mrf.mxu1 }
 0x17e   : > { %v887_v12 = vadd.f32 1.0, %v1255_v10  ;;  %v1112_v13 = vmul.f32 -1.442695, %v1600_v9  ;;  %v1603_v14 = vadd.f32 %v827_v11, %v665_v8 }
 0x17f   : > { %v1257_v15 = vpop.eup %1256 }
 0x180   : > { %1270 = vrcp.f32 %v887_v12  ;;  %v886_v16 = vadd.f32 1.0, %v1257_v15  ;;  %v1111_v17 = vmul.f32 -1.442695, %v1603_v14 }
 0x181   : > { %1272 = vpow2.f32 %v1112_v13 }
 0x182   : > { %1274 = vrcp.f32 %v886_v16 }
 0x183   : > { %v1259_v19 = vpop.eup %1258  ;;  %1276 = vpow2.f32 %v1111_v17  ;;  %v1200_v20 = vpop.f32.mrf.mxu1 }
 0x184   : > { %v919_v21 = vmul.f32 %v1259_v19, %v1576_v34  ;;  %v1609_v22 = vadd.f32 %v1200_v20, %v1174_v18 }
 0x185   : > { %v1261_v23 = vpop.eup %1260  ;;  %v837_v25 = vpop.f32.mrf.mxu1 }
 0x186   : > { %v1263_v26 = vpop.eup %1262  ;;  %v931_v27 = vmul.f32 1.6666666, %v919_v21  ;;  %v918_v28 = vmul.f32 %v1261_v23, %v1579_v37  ;;  %v1114_v29 = vmul.f32 -1.442695, %v1609_v22  ;;  %v838_v30 = vadd.f32 %v837_v25, %v675_v24 }
 0x187   : > { %v1265_v31 = vpop.eup %1264  ;;  %v889_v32 = vadd.f32 1.0, %v1263_v26 }
 0x188   : > { %v1267_v33 = vpop.eup %1266  ;;  %943 = vst [vmem:[%s1613_s16 + $0x8] sm:$0xff] %v931_v27  ;;  %v930_v34 = vmul.f32 1.6666666, %v918_v28  ;;  %v921_v35 = vmul.f32 %v1265_v31, %v1582_v41  ;;  %1278 = vpow2.f32 %v1114_v29  ;;  %v1113_v36 = vmul.f32 -1.442695, %v838_v30 }
 0x189   : > { %v1269_v38 = vpop.eup %1268  ;;  %1280 = vrcp.f32 %v889_v32  ;;  %v888_v37 = vadd.f32 1.0, %v1267_v33 }
 0x18a   : > { %942 = vst [vmem:[%s1613_s16] sm:$0xff] %v930_v34  ;;  %v933_v39 = vmul.f32 1.6666666, %v921_v35  ;;  %v920_v40 = vmul.f32 %v1269_v38, %v1585_v45  ;;  %1282 = vpow2.f32 %v1113_v36 }
 0x18b   : > { %1284 = vrcp.f32 %v888_v37 }
 0x18c   : > { %945 = vst [vmem:[%s1613_s16 + $0x18] sm:$0xff] %v933_v39  ;;  %v932_v42 = vmul.f32 1.6666666, %v920_v40 }
 0x18d   : > { %v1271_v43 = vpop.eup %1270 }
 0x18e   : > { %v1273_v44 = vpop.eup %1272  ;;  %944 = vst [vmem:[%s1613_s16 + $0x10] sm:$0xff] %v932_v42  ;;  %v923_v41 = vmul.f32 %v1271_v43, %v1588_v49 }
 0x18f   : > { %v1275_v46 = vpop.eup %1274  ;;  %v891_v47 = vadd.f32 1.0, %v1273_v44 }
 0x190   : > { %v1277_v48 = vpop.eup %1276  ;;  %v935_v50 = vmul.f32 1.6666666, %v923_v41  ;;  %v922_v51 = vmul.f32 %v1275_v46, %v1591_v52 }
 0x191   : > { %1286 = vrcp.f32 %v891_v47  ;;  %v890_v53 = vadd.f32 1.0, %v1277_v48 }
 0x192   : > { %947 = vst [vmem:[%s1613_s16 + $0x28] sm:$0xff] %v935_v50  ;;  %v934_v45 = vmul.f32 1.6666666, %v922_v51 }
 0x193   : > { %1288 = vrcp.f32 %v890_v53 }
 0x194   : > { %946 = vst [vmem:[%s1613_s16 + $0x20] sm:$0xff] %v934_v45 }
 0x195   : > { %v1279_v54 = vpop.eup %1278 }
 0x196   : > { %v1281_v55 = vpop.eup %1280  ;;  %v893_v56 = vadd.f32 1.0, %v1279_v54 }
 0x197   : > { %v1283_v57 = vpop.eup %1282  ;;  %v925_v49 = vmul.f32 %v1281_v55, %v1594_v59 }
 0x198   : > { %v1285_v58 = vpop.eup %1284  ;;  %1290 = vrcp.f32 %v893_v56  ;;  %v892_v60 = vadd.f32 1.0, %v1283_v57 }
 0x199   : > { %v937_v52 = vmul.f32 1.6666666, %v925_v49  ;;  %v924_v61 = vmul.f32 %v1285_v58, %v1597_v0 }
 0x19a   : > { %1292 = vrcp.f32 %v892_v60 }
 0x19b   : > { %949 = vst [vmem:[%s1613_s16 + $0x38] sm:$0xff] %v937_v52  ;;  %v936_v62 = vmul.f32 1.6666666, %v924_v61 }
 0x19d   : > { %948 = vst [vmem:[%s1613_s16 + $0x30] sm:$0xff] %v936_v62 }
 0x19e   : > { %v1287_v63 = vpop.eup %1286 }
 0x19f   : > { %v927_v1 = vmul.f32 %v1287_v63, %v1600_v9 }
 0x1a0   : > { %v1289_v2 = vpop.eup %1288 }
 0x1a1   : > { %v939_v3 = vmul.f32 1.6666666, %v927_v1  ;;  %v926_v59 = vmul.f32 %v1289_v2, %v1603_v14 }
 0x1a3   : > { %951 = vst [vmem:[%s1613_s16 + $0x48] sm:$0xff] %v939_v3  ;;  %v938_v4 = vmul.f32 1.6666666, %v926_v59 }
 0x1a5   : > { %v1291_v5 = vpop.eup %1290  ;;  %950 = vst [vmem:[%s1613_s16 + $0x40] sm:$0xff] %v938_v4 }
 0x1a6   : > { %v929_v0 = vmul.f32 %v1291_v5, %v1609_v22 }
 0x1a7   : > { %v1293_v6 = vpop.eup %1292 }
 0x1a8   : > { %v941_v7 = vmul.f32 1.6666666, %v929_v0  ;;  %v928_v8 = vmul.f32 %v1293_v6, %v838_v30  ;;  %961 = sbr.rel (!%p1429_p5) target bundleno = 456 (0x1c8), region = 44 }
 0x1aa   : > { %953 = vst [vmem:[%s1613_s16 + $0x58] sm:$0xff] %v941_v7  ;;  %v940_v10 = vmul.f32 1.6666666, %v928_v8 }
 0x1ac   : > { %952 = vst [vmem:[%s1613_s16 + $0x50] sm:$0xff] %v940_v10 }
 0x1ad   : > { %s1711_s23 = smov (!%p964_p11, %s963_s23), 12 }
 0x1ae   : > { %s1643_s25 = sshll.u32 %s1711_s23, 7 }
 0x1af   : > { %s968_s26 = ssub.s32 1536, %s1643_s25 }
 0x1b0   : > { %969 = vsyncadd %s1638_s17, %s968_s26  ;;  %p1116_p12 = scmp.ne.s32.totalorder %s1643_s25, 0  ;;  %s1122_s6 = smul.u32 1536, %s1412_s22 }
 0x1b1   : > { %s974_s8 = sshll.u32 %s1613_s16, 4  ;;  %s1358_s12 = smov [#allocation2]   ;;  %s1655_s8 = int_to_ptr.vmem [resolvable:$true] %s974_s8 }
 0x1b2   : > { %s1653_s11 = scalar_lea.hbm %s1703_s5, %s1122_s6  ;;  %s1294_s30 = scalar_lea.vmem %s1655_s8, %s1643_s25 }
 0x1b3   : > { %p1295_p13 = scmp.ne.s32.totalorder %s1655_s8, %s1294_s30  ;;  %s1298_s14 = sshll.u32 %s1358_s12, 4  ;;  %s1299_s14 = int_to_ptr.vmem [resolvable:$false] %s1298_s14 }
 0x1b4   : > { %s1300_s22 = scalar_lea.vmem %s1299_s14, 3072  ;;  %p1301_p2 = scmp.lt.s32.totalorder %s1655_s8, %s1299_s14 }
 0x1b5   : > { %p1296_p0 = pnand %p1295_p13, %p1116_p12  ;;  %p1302_p3 = scmp.lt.s32.totalorder %s1300_s22, %s1294_s30 }
 0x1b7   : > { %p1297_p1 = pneg %p1296_p0  ;;  %p1303_p4 = por %p1302_p3, %p1301_p2 }
 0x1b9   : > { %p1304_p5 = pnand %p1303_p4, %p1297_p1 }
 0x1bb   : > { %1307 = shalt.err (!%p1304_p5)
}
 0x1bc   : > { %s1308_s7 = scalar_lea.hbm %s1653_s11, %s1643_s25  ;;  %s1312_s13 = scalar_lea.hbm %s1703_s5, 1664 }
 0x1bd   : > { %p1309_p7 = scmp.ne.s32.totalorder %s1653_s11, %s1308_s7  ;;  %p1313_p10 = scmp.lt.s32.totalorder %s1653_s11, %s1703_s5 }
 0x1be   : > { %p1314_p11 = scmp.lt.s32.totalorder %s1312_s13, %s1308_s7 }
 0x1bf   : > { %p1310_p8 = pnand %p1309_p7, %p1116_p12 }
 0x1c0   : > { %p1315_p13 = por %p1314_p11, %p1313_p10 }
 0x1c1   : > { %p1311_p9 = pneg %p1310_p8 }
 0x1c3   : > { %p1316_p0 = pnand %p1315_p13, %p1311_p9 }
 0x1c5   : > { %1319 = shalt.err (!%p1316_p0)
}
 0x1c6   : > { %s1359_s26 = smov 128   ;;  %s1360_s6 = smov 8  }
 0x1c7   : > { %980 = dma.vmem_to_hbm [thread:$0]  (%p1116_p12), %s1655_s8, %s1643_s25, %s1653_s11, %s1638_s17, %s1359_s26, %s1359_s26, %s1360_s6  }
 0x1c8 PF: > { %p1207_p1 = scmp.ge.s32.totalorder %s1354_s21, 2  ;;  %s989_s28 = sand.u32 1, %s1342_s18  }
 0x1c9   : > { %s990_s9 = scalar_lea.sflag [#allocation3], %s989_s28 }
 0x1ca   : > { %p1204_p2 = pnand %p1207_p1, %p1433_p6 }
 0x1cc   : > { %p1205_p3 = pneg %p1204_p2 }
 0x1ce   : > { %1337 = dma.done.wait (%p1205_p3), %s990_s9, 1536  }
 0x1cf   : > { %1339 = vsyncadd (%p1205_p3), %s990_s9, 4294965760  ;;  %p15_p4 = scmp.ge.s32.totalorder %s1416_s24, 4   ;;  %s1706_s18 = smov %s1346_s19 }
 0x1d0   : > { %s1707_s19 = smov %s1350_s20  ;;  %s1708_s20 = smov %s1427_s27 }
 0x1d1   : > { %s1709_s21 = smov %s1416_s24  ;;  %17 = sbr.rel (!%p15_p4) target bundleno = 3 (0x3), region = 81 }
 0x1d6   :  { %995 = vsyncpa [#allocation3], 1 }
 0x1d7   :  { %997 = vsyncpa [#allocation3 + $0x1], 1 }

</bundles_post_ra>
